<compile_context>
chip_gen: v6e
topology: v6e:2x2x1
jax: 0.10.0
libtpu: 0.0.40
codegen_flags: <defaults>
</compile_context>

<pallas_src>
import functools

import jax
import jax.numpy as jnp
from jax.experimental import pallas as pl
from jax.experimental.pallas import tpu as pltpu

LANE = 128   # TPU vreg lane width: all feature dims padded to this
SUB = 16     # node-axis padding (bf16 sublane packing = 16 rows/sublane-pair)


def _round_up(x, m):
    return (x + m - 1) // m * m


def _pad2d(x, rows, cols):
    r, c = x.shape
    return jnp.pad(x, ((0, rows - r), (0, cols - c)))


# ----------------------------- fused Pallas kernel -----------------------------

def _fused_forward_kernel(a_ref, h_ref, v_ref, gnn_w_ref, gnn_b_ref,
                          w1g_ref, w1v_ref, b1_ref, mlp_w_ref, mlp_b_ref,
                          o_ref, *, num_gnn_layers, num_mlp_layers):
    """Whole forward in one kernel; everything VMEM-resident.

    a_ref     : (Np, Np)      bf16   normalized adjacency A_hat
    h_ref     : (Np, D)       bf16   padded node features
    v_ref     : (Np, Vp)      bf16   padded vision features
    gnn_w_ref : (Lg, D, D)    bf16   stacked GCN weights
    gnn_b_ref : (Lg, 1, D)    f32    stacked GCN biases
    w1g_ref   : (D, M)        bf16   first MLP weight, GNN rows
    w1v_ref   : (Vp, M)       bf16   first MLP weight, vision rows
    b1_ref    : (1, M)        f32
    mlp_w_ref : (Lm-1, M, M)  bf16   stacked trailing MLP weights
    mlp_b_ref : (Lm-1, 1, M)  f32
    o_ref     : (Np, M)       f32
    """
    a = a_ref[...]
    h = h_ref[...]

    # GCN stack (JK='last'): h = ReLU((A_hat @ h) @ W + b).
    # bf16 operands on the MXU, f32 accumulation; f32 bias/ReLU epilogue.
    for l in range(num_gnn_layers):
        agg = jnp.dot(a, h, preferred_element_type=jnp.float32)
        z = jnp.dot(agg.astype(jnp.bfloat16), gnn_w_ref[l],
                    preferred_element_type=jnp.float32)
        h = jnp.maximum(z + gnn_b_ref[l], 0.0).astype(jnp.bfloat16)

    # Concat-free first MLP layer: [g | v] @ W1 == g @ W1[:H] + v @ W1[H:].
    x = jnp.dot(h, w1g_ref[...], preferred_element_type=jnp.float32)
    x = x + jnp.dot(v_ref[...], w1v_ref[...],
                    preferred_element_type=jnp.float32)
    x = jnp.maximum(x + b1_ref[...], 0.0)

    # Remaining MLP linears; ReLU on all but the last (Dropout == identity).
    for i in range(num_mlp_layers - 1):
        y = jnp.dot(x.astype(jnp.bfloat16), mlp_w_ref[i],
                    preferred_element_type=jnp.float32)
        y = y + mlp_b_ref[i]
        if i < num_mlp_layers - 2:
            y = jnp.maximum(y, 0.0)
        x = y

    o_ref[...] = x.astype(o_ref.dtype)


def _fused_forward(a_hat, h0, vis, gnn_w, gnn_b, w1_g, w1_v, b1, mlp_w, mlp_b):
    num_gnn = gnn_w.shape[0]
    num_mlp = mlp_w.shape[0] + 1
    np_, d = h0.shape
    vp = vis.shape[1]
    m = w1_g.shape[1]

    operands = [a_hat, h0, vis, gnn_w, gnn_b, w1_g, w1_v, b1, mlp_w, mlp_b]

    flops = 2 * (num_gnn * (np_ * np_ * d + np_ * d * d)
                 + np_ * d * m + np_ * vp * m
                 + (num_mlp - 1) * np_ * m * m)
    bytes_accessed = (sum(int(x.size) * x.dtype.itemsize for x in operands)
                      + np_ * m * 4)

    kernel = functools.partial(_fused_forward_kernel,
                               num_gnn_layers=num_gnn,
                               num_mlp_layers=num_mlp)
    vmem = pl.BlockSpec(memory_space=pltpu.MemorySpace.VMEM)
    # Whole problem (< 1 MiB) fits VMEM: no grid, everything resident.
    return pl.pallas_call(
        kernel,
        out_shape=jax.ShapeDtypeStruct((np_, m), jnp.float32),
        in_specs=[vmem] * len(operands),
        out_specs=vmem,
        cost_estimate=pl.CostEstimate(flops=flops, transcendentals=0,
                                      bytes_accessed=bytes_accessed),
    )(*operands)


# --------------------- one-time graph / parameter preparation ---------------------

def build_normalized_adjacency(edge_index, num_nodes):
    """PyG gcn_norm: A_hat = D^-1/2 (A + remaining self loops) D^-1/2.

    Built with a one-hot matmul (no serial scatter).  Duplicate edges
    accumulate (like PyG message aggregation); self loops are added only for
    nodes that do not already have one (add_remaining_self_loops).  Message
    direction src -> dst; degree is the in-degree (dst/col index).
    """
    src = edge_index[0]
    dst = edge_index[1]
    nodes = jnp.arange(num_nodes)
    dst_oh = (dst[None, :] == nodes[:, None]).astype(jnp.float32)   # (N, E)
    src_oh = (src[:, None] == nodes[None, :]).astype(jnp.float32)   # (E, N)
    a = dst_oh @ src_oh                                             # A[dst, src]
    diag = jnp.diagonal(a)
    a = a + jnp.diag(jnp.where(diag == 0, 1.0, 0.0))                # remaining self loops
    deg = a.sum(axis=1)
    d_inv_sqrt = jnp.where(deg > 0.0, jax.lax.rsqrt(deg), 0.0)
    return d_inv_sqrt[:, None] * a * d_inv_sqrt[None, :]


def prepare_forward_constants(params, edge_index, vision_features, num_nodes):
    """Run ONCE: pad / stack / cast everything the hot path needs."""
    np_ = _round_up(num_nodes, SUB)

    a_hat = build_normalized_adjacency(edge_index, num_nodes)
    a_p = _pad2d(a_hat, np_, np_).astype(jnp.bfloat16)

    vp = _round_up(vision_features.shape[1], LANE)
    vis_p = _pad2d(vision_features, np_, vp).astype(jnp.bfloat16)

    # Common padded width D for all GCN in/out dims (zero padding is exact).
    d = max(max(_round_up(w.shape[0], LANE) for w, _ in params["gnn"]),
            max(_round_up(w.shape[1], LANE) for w, _ in params["gnn"]))
    gnn_w = jnp.stack([_pad2d(w, d, d) for w, _ in params["gnn"]]
                      ).astype(jnp.bfloat16)
    gnn_b = jnp.stack([_pad2d(b.reshape(1, -1), 1, d)
                       for _, b in params["gnn"]])                    # f32

    # Common padded width M for all MLP dims.
    m = max(max(_round_up(w.shape[1], LANE) for w, _ in params["mlp"]),
            max(_round_up(w.shape[0], LANE) for w, _ in params["mlp"][1:]))

    # First MLP weight split along its input axis -> concat-free fused layer.
    w1, b1 = params["mlp"][0]
    gnn_hidden = params["gnn"][-1][0].shape[1]
    w1_g = _pad2d(w1[:gnn_hidden], d, m).astype(jnp.bfloat16)
    w1_v = _pad2d(w1[gnn_hidden:], vp, m).astype(jnp.bfloat16)
    b1_p = _pad2d(b1.reshape(1, -1), 1, m)                            # f32

    mlp_w = jnp.stack([_pad2d(w, m, m) for w, _ in params["mlp"][1:]]
                      ).astype(jnp.bfloat16)
    mlp_b = jnp.stack([_pad2d(b.reshape(1, -1), 1, m)
                       for _, b in params["mlp"][1:]])                # f32

    return {"a_hat": a_p, "vis": vis_p,
            "gnn_w": gnn_w, "gnn_b": gnn_b,
            "w1_g": w1_g, "w1_v": w1_v, "b1": b1_p,
            "mlp_w": mlp_w, "mlp_b": mlp_b}


def init_params(key, node_attr_dim, gnn_hidden_dim, vision_dim,
                mlp_hidden_dim, mlp_out_dim, num_gnn_layers):
    params = {"gnn": [], "mlp": []}
    dims_gnn = [node_attr_dim] + [gnn_hidden_dim] * num_gnn_layers
    for i in range(num_gnn_layers):
        key, kw = jax.random.split(key)
        fan_in = dims_gnn[i]
        w = jax.random.normal(kw, (dims_gnn[i], dims_gnn[i + 1]),
                              jnp.float32) * (1.0 / jnp.sqrt(fan_in))
        b = jnp.zeros((dims_gnn[i + 1],), jnp.float32)
        params["gnn"].append((w, b))

    mlp_dims = [gnn_hidden_dim + vision_dim] + [mlp_hidden_dim] * 4 + [mlp_out_dim]
    for i in range(5):
        key, kw = jax.random.split(key)
        fan_in = mlp_dims[i]
        w = jax.random.normal(kw, (mlp_dims[i], mlp_dims[i + 1]),
                              jnp.float32) * (1.0 / jnp.sqrt(fan_in))
        b = jnp.zeros((mlp_dims[i + 1],), jnp.float32)
        params["mlp"].append((w, b))
    return params


# ------------------------------- hot forward path -------------------------------

@functools.partial(jax.jit, static_argnames=("mlp_out_dim",))
def gnn_vision_mlp_forward(prepared, node_attr, edge_attr, *, mlp_out_dim):
    """Per-call work: one pad of node_attr + one fused pallas_call + a slice."""
    # TODO(synk): edge_attr is not consumed by a plain GCNConv stack.
    del edge_attr

    n = node_attr.shape[0]
    np_ = prepared["a_hat"].shape[0]
    d = prepared["gnn_w"].shape[1]

    h0 = _pad2d(node_attr, np_, d).astype(jnp.bfloat16)

    out_p = _fused_forward(prepared["a_hat"], h0, prepared["vis"],
                           prepared["gnn_w"], prepared["gnn_b"],
                           prepared["w1_g"], prepared["w1_v"], prepared["b1"],
                           prepared["mlp_w"], prepared["mlp_b"])
    return out_p[:n, :mlp_out_dim]


# ---------------------------------- main ----------------------------------

if __name__ == "__main__":
    # Small, deterministic shapes consistent with the module's forward
    # (mlp_hidden_dim / mlp_out_dim match the module defaults of 128).
    num_nodes = 16
    node_attr_dim = 8
    edge_attr_dim = 4
    gnn_hidden_dim = 32
    vision_dim = 64
    mlp_hidden_dim = 128
    mlp_out_dim = 128
    num_gnn_layers = 3
    num_edges = 48

    key = jax.random.PRNGKey(0)
    k_na, k_ei, k_ea, k_vis, k_par = jax.random.split(key, 5)

    node_attr = jax.random.normal(k_na, (num_nodes, node_attr_dim), jnp.float32)
    edge_index = jax.random.randint(k_ei, (2, num_edges), 0, num_nodes,
                                    dtype=jnp.int32)
    edge_attr = jax.random.normal(k_ea, (num_edges, edge_attr_dim), jnp.float32)
    # Synthetic stand-in for np.load('./embeddings/.../MA.npy').
    vision_features = jax.random.normal(k_vis, (num_nodes, vision_dim),
                                        jnp.float32)

    params = init_params(k_par, node_attr_dim, gnn_hidden_dim, vision_dim,
                         mlp_hidden_dim, mlp_out_dim, num_gnn_layers)

    # One-time prep (padding, stacking, bf16 cast, adjacency normalization).
    prepared = prepare_forward_constants(params, edge_index, vision_features,
                                         num_nodes)
    prepared = jax.tree_util.tree_map(jax.block_until_ready, prepared)

    out = gnn_vision_mlp_forward(prepared, node_attr, edge_attr,
                                 mlp_out_dim=mlp_out_dim)
    out = jax.block_until_ready(out)
    assert out.shape == (num_nodes, mlp_out_dim)
    assert bool(jnp.all(jnp.isfinite(out)))
    print("KERNEL_OK")
</pallas_src>

<mosaic_0001>
module attributes {stable_mosaic.version = 11 : i64} {
  func.func @_fused_forward_kernel(%arg0: memref<16x16xbf16, #tpu.memory_space<vmem>>, %arg1: memref<16x128xbf16, #tpu.memory_space<vmem>>, %arg2: memref<16x128xbf16, #tpu.memory_space<vmem>>, %arg3: memref<3x128x128xbf16, #tpu.memory_space<vmem>>, %arg4: memref<3x1x128xf32, #tpu.memory_space<vmem>>, %arg5: memref<128x128xbf16, #tpu.memory_space<vmem>>, %arg6: memref<128x128xbf16, #tpu.memory_space<vmem>>, %arg7: memref<1x128xf32, #tpu.memory_space<vmem>>, %arg8: memref<4x128x128xbf16, #tpu.memory_space<vmem>>, %arg9: memref<4x1x128xf32, #tpu.memory_space<vmem>>, %arg10: memref<16x128xf32, #tpu.memory_space<vmem>>) attributes {dimension_semantics = [], scalar_prefetch = 0 : i64, scratch_operands = 0 : i64, tpu.core_type = #tpu.core_type<tc>} {
    %c0 = arith.constant 0 : index
    %c0_0 = arith.constant 0 : index
    %0 = vector.load %arg0[%c0, %c0_0] : memref<16x16xbf16, #tpu.memory_space<vmem>>, vector<16x16xbf16>
    %c0_1 = arith.constant 0 : index
    %c0_2 = arith.constant 0 : index
    %1 = vector.load %arg1[%c0_1, %c0_2] : memref<16x128xbf16, #tpu.memory_space<vmem>>, vector<16x128xbf16>
    %cst = arith.constant dense<0.000000e+00> : vector<16x128xf32>
    %2 = tpu.matmul %0, %1, %cst {dimension_numbers = #tpu.dot_dimension_numbers<[1], [0], [0], [1], [0, 0, 1, 1], [], []>} : vector<16x16xbf16>, vector<16x128xbf16>, vector<16x128xf32> -> vector<16x128xf32>
    %3 = arith.truncf %2 : vector<16x128xf32> to vector<16x128xbf16>
    %c0_3 = arith.constant 0 : index
    %c0_4 = arith.constant 0 : index
    %c0_5 = arith.constant 0 : index
    %4 = vector.load %arg3[%c0_3, %c0_4, %c0_5] : memref<3x128x128xbf16, #tpu.memory_space<vmem>>, vector<1x128x128xbf16>
    %5 = vector.shape_cast %4 : vector<1x128x128xbf16> to vector<128x128xbf16>
    %cst_6 = arith.constant dense<0.000000e+00> : vector<16x128xf32>
    %6 = tpu.matmul %3, %5, %cst_6 {dimension_numbers = #tpu.dot_dimension_numbers<[1], [0], [0], [1], [0, 0, 1, 1], [], []>} : vector<16x128xbf16>, vector<128x128xbf16>, vector<16x128xf32> -> vector<16x128xf32>
    %c0_7 = arith.constant 0 : index
    %c0_8 = arith.constant 0 : index
    %c0_9 = arith.constant 0 : index
    %7 = vector.load %arg4[%c0_7, %c0_8, %c0_9] : memref<3x1x128xf32, #tpu.memory_space<vmem>>, vector<1x1x128xf32>
    %8 = vector.shape_cast %7 : vector<1x1x128xf32> to vector<1x128xf32>
    %9 = vector.broadcast %8 : vector<1x128xf32> to vector<16x128xf32>
    %10 = arith.addf %6, %9 : vector<16x128xf32>
    %cst_10 = arith.constant 0.000000e+00 : f32
    %11 = vector.broadcast %cst_10 : f32 to vector<16x128xf32>
    %12 = arith.maximumf %10, %11 : vector<16x128xf32>
    %13 = arith.truncf %12 : vector<16x128xf32> to vector<16x128xbf16>
    %cst_11 = arith.constant dense<0.000000e+00> : vector<16x128xf32>
    %14 = tpu.matmul %0, %13, %cst_11 {dimension_numbers = #tpu.dot_dimension_numbers<[1], [0], [0], [1], [0, 0, 1, 1], [], []>} : vector<16x16xbf16>, vector<16x128xbf16>, vector<16x128xf32> -> vector<16x128xf32>
    %15 = arith.truncf %14 : vector<16x128xf32> to vector<16x128xbf16>
    %c1 = arith.constant 1 : index
    %c0_12 = arith.constant 0 : index
    %c0_13 = arith.constant 0 : index
    %16 = vector.load %arg3[%c1, %c0_12, %c0_13] : memref<3x128x128xbf16, #tpu.memory_space<vmem>>, vector<1x128x128xbf16>
    %17 = vector.shape_cast %16 : vector<1x128x128xbf16> to vector<128x128xbf16>
    %cst_14 = arith.constant dense<0.000000e+00> : vector<16x128xf32>
    %18 = tpu.matmul %15, %17, %cst_14 {dimension_numbers = #tpu.dot_dimension_numbers<[1], [0], [0], [1], [0, 0, 1, 1], [], []>} : vector<16x128xbf16>, vector<128x128xbf16>, vector<16x128xf32> -> vector<16x128xf32>
    %c1_15 = arith.constant 1 : index
    %c0_16 = arith.constant 0 : index
    %c0_17 = arith.constant 0 : index
    %19 = vector.load %arg4[%c1_15, %c0_16, %c0_17] : memref<3x1x128xf32, #tpu.memory_space<vmem>>, vector<1x1x128xf32>
    %20 = vector.shape_cast %19 : vector<1x1x128xf32> to vector<1x128xf32>
    %21 = vector.broadcast %20 : vector<1x128xf32> to vector<16x128xf32>
    %22 = arith.addf %18, %21 : vector<16x128xf32>
    %cst_18 = arith.constant 0.000000e+00 : f32
    %23 = vector.broadcast %cst_18 : f32 to vector<16x128xf32>
    %24 = arith.maximumf %22, %23 : vector<16x128xf32>
    %25 = arith.truncf %24 : vector<16x128xf32> to vector<16x128xbf16>
    %cst_19 = arith.constant dense<0.000000e+00> : vector<16x128xf32>
    %26 = tpu.matmul %0, %25, %cst_19 {dimension_numbers = #tpu.dot_dimension_numbers<[1], [0], [0], [1], [0, 0, 1, 1], [], []>} : vector<16x16xbf16>, vector<16x128xbf16>, vector<16x128xf32> -> vector<16x128xf32>
    %27 = arith.truncf %26 : vector<16x128xf32> to vector<16x128xbf16>
    %c2 = arith.constant 2 : index
    %c0_20 = arith.constant 0 : index
    %c0_21 = arith.constant 0 : index
    %28 = vector.load %arg3[%c2, %c0_20, %c0_21] : memref<3x128x128xbf16, #tpu.memory_space<vmem>>, vector<1x128x128xbf16>
    %29 = vector.shape_cast %28 : vector<1x128x128xbf16> to vector<128x128xbf16>
    %cst_22 = arith.constant dense<0.000000e+00> : vector<16x128xf32>
    %30 = tpu.matmul %27, %29, %cst_22 {dimension_numbers = #tpu.dot_dimension_numbers<[1], [0], [0], [1], [0, 0, 1, 1], [], []>} : vector<16x128xbf16>, vector<128x128xbf16>, vector<16x128xf32> -> vector<16x128xf32>
    %c2_23 = arith.constant 2 : index
    %c0_24 = arith.constant 0 : index
    %c0_25 = arith.constant 0 : index
    %31 = vector.load %arg4[%c2_23, %c0_24, %c0_25] : memref<3x1x128xf32, #tpu.memory_space<vmem>>, vector<1x1x128xf32>
    %32 = vector.shape_cast %31 : vector<1x1x128xf32> to vector<1x128xf32>
    %33 = vector.broadcast %32 : vector<1x128xf32> to vector<16x128xf32>
    %34 = arith.addf %30, %33 : vector<16x128xf32>
    %cst_26 = arith.constant 0.000000e+00 : f32
    %35 = vector.broadcast %cst_26 : f32 to vector<16x128xf32>
    %36 = arith.maximumf %34, %35 : vector<16x128xf32>
    %37 = arith.truncf %36 : vector<16x128xf32> to vector<16x128xbf16>
    %c0_27 = arith.constant 0 : index
    %c0_28 = arith.constant 0 : index
    %38 = vector.load %arg5[%c0_27, %c0_28] : memref<128x128xbf16, #tpu.memory_space<vmem>>, vector<128x128xbf16>
    %cst_29 = arith.constant dense<0.000000e+00> : vector<16x128xf32>
    %39 = tpu.matmul %37, %38, %cst_29 {dimension_numbers = #tpu.dot_dimension_numbers<[1], [0], [0], [1], [0, 0, 1, 1], [], []>} : vector<16x128xbf16>, vector<128x128xbf16>, vector<16x128xf32> -> vector<16x128xf32>
    %c0_30 = arith.constant 0 : index
    %c0_31 = arith.constant 0 : index
    %40 = vector.load %arg2[%c0_30, %c0_31] : memref<16x128xbf16, #tpu.memory_space<vmem>>, vector<16x128xbf16>
    %c0_32 = arith.constant 0 : index
    %c0_33 = arith.constant 0 : index
    %41 = vector.load %arg6[%c0_32, %c0_33] : memref<128x128xbf16, #tpu.memory_space<vmem>>, vector<128x128xbf16>
    %cst_34 = arith.constant dense<0.000000e+00> : vector<16x128xf32>
    %42 = tpu.matmul %40, %41, %cst_34 {dimension_numbers = #tpu.dot_dimension_numbers<[1], [0], [0], [1], [0, 0, 1, 1], [], []>} : vector<16x128xbf16>, vector<128x128xbf16>, vector<16x128xf32> -> vector<16x128xf32>
    %43 = arith.addf %39, %42 : vector<16x128xf32>
    %c0_35 = arith.constant 0 : index
    %c0_36 = arith.constant 0 : index
    %44 = vector.load %arg7[%c0_35, %c0_36] : memref<1x128xf32, #tpu.memory_space<vmem>>, vector<1x128xf32>
    %45 = vector.broadcast %44 : vector<1x128xf32> to vector<16x128xf32>
    %46 = arith.addf %43, %45 : vector<16x128xf32>
    %cst_37 = arith.constant 0.000000e+00 : f32
    %47 = vector.broadcast %cst_37 : f32 to vector<16x128xf32>
    %48 = arith.maximumf %46, %47 : vector<16x128xf32>
    %49 = arith.truncf %48 : vector<16x128xf32> to vector<16x128xbf16>
    %c0_38 = arith.constant 0 : index
    %c0_39 = arith.constant 0 : index
    %c0_40 = arith.constant 0 : index
    %50 = vector.load %arg8[%c0_38, %c0_39, %c0_40] : memref<4x128x128xbf16, #tpu.memory_space<vmem>>, vector<1x128x128xbf16>
    %51 = vector.shape_cast %50 : vector<1x128x128xbf16> to vector<128x128xbf16>
    %cst_41 = arith.constant dense<0.000000e+00> : vector<16x128xf32>
    %52 = tpu.matmul %49, %51, %cst_41 {dimension_numbers = #tpu.dot_dimension_numbers<[1], [0], [0], [1], [0, 0, 1, 1], [], []>} : vector<16x128xbf16>, vector<128x128xbf16>, vector<16x128xf32> -> vector<16x128xf32>
    %c0_42 = arith.constant 0 : index
    %c0_43 = arith.constant 0 : index
    %c0_44 = arith.constant 0 : index
    %53 = vector.load %arg9[%c0_42, %c0_43, %c0_44] : memref<4x1x128xf32, #tpu.memory_space<vmem>>, vector<1x1x128xf32>
    %54 = vector.shape_cast %53 : vector<1x1x128xf32> to vector<1x128xf32>
    %55 = vector.broadcast %54 : vector<1x128xf32> to vector<16x128xf32>
    %56 = arith.addf %52, %55 : vector<16x128xf32>
    %cst_45 = arith.constant 0.000000e+00 : f32
    %57 = vector.broadcast %cst_45 : f32 to vector<16x128xf32>
    %58 = arith.maximumf %56, %57 : vector<16x128xf32>
    %59 = arith.truncf %58 : vector<16x128xf32> to vector<16x128xbf16>
    %c1_46 = arith.constant 1 : index
    %c0_47 = arith.constant 0 : index
    %c0_48 = arith.constant 0 : index
    %60 = vector.load %arg8[%c1_46, %c0_47, %c0_48] : memref<4x128x128xbf16, #tpu.memory_space<vmem>>, vector<1x128x128xbf16>
    %61 = vector.shape_cast %60 : vector<1x128x128xbf16> to vector<128x128xbf16>
    %cst_49 = arith.constant dense<0.000000e+00> : vector<16x128xf32>
    %62 = tpu.matmul %59, %61, %cst_49 {dimension_numbers = #tpu.dot_dimension_numbers<[1], [0], [0], [1], [0, 0, 1, 1], [], []>} : vector<16x128xbf16>, vector<128x128xbf16>, vector<16x128xf32> -> vector<16x128xf32>
    %c1_50 = arith.constant 1 : index
    %c0_51 = arith.constant 0 : index
    %c0_52 = arith.constant 0 : index
    %63 = vector.load %arg9[%c1_50, %c0_51, %c0_52] : memref<4x1x128xf32, #tpu.memory_space<vmem>>, vector<1x1x128xf32>
    %64 = vector.shape_cast %63 : vector<1x1x128xf32> to vector<1x128xf32>
    %65 = vector.broadcast %64 : vector<1x128xf32> to vector<16x128xf32>
    %66 = arith.addf %62, %65 : vector<16x128xf32>
    %cst_53 = arith.constant 0.000000e+00 : f32
    %67 = vector.broadcast %cst_53 : f32 to vector<16x128xf32>
    %68 = arith.maximumf %66, %67 : vector<16x128xf32>
    %69 = arith.truncf %68 : vector<16x128xf32> to vector<16x128xbf16>
    %c2_54 = arith.constant 2 : index
    %c0_55 = arith.constant 0 : index
    %c0_56 = arith.constant 0 : index
    %70 = vector.load %arg8[%c2_54, %c0_55, %c0_56] : memref<4x128x128xbf16, #tpu.memory_space<vmem>>, vector<1x128x128xbf16>
    %71 = vector.shape_cast %70 : vector<1x128x128xbf16> to vector<128x128xbf16>
    %cst_57 = arith.constant dense<0.000000e+00> : vector<16x128xf32>
    %72 = tpu.matmul %69, %71, %cst_57 {dimension_numbers = #tpu.dot_dimension_numbers<[1], [0], [0], [1], [0, 0, 1, 1], [], []>} : vector<16x128xbf16>, vector<128x128xbf16>, vector<16x128xf32> -> vector<16x128xf32>
    %c2_58 = arith.constant 2 : index
    %c0_59 = arith.constant 0 : index
    %c0_60 = arith.constant 0 : index
    %73 = vector.load %arg9[%c2_58, %c0_59, %c0_60] : memref<4x1x128xf32, #tpu.memory_space<vmem>>, vector<1x1x128xf32>
    %74 = vector.shape_cast %73 : vector<1x1x128xf32> to vector<1x128xf32>
    %75 = vector.broadcast %74 : vector<1x128xf32> to vector<16x128xf32>
    %76 = arith.addf %72, %75 : vector<16x128xf32>
    %cst_61 = arith.constant 0.000000e+00 : f32
    %77 = vector.broadcast %cst_61 : f32 to vector<16x128xf32>
    %78 = arith.maximumf %76, %77 : vector<16x128xf32>
    %79 = arith.truncf %78 : vector<16x128xf32> to vector<16x128xbf16>
    %c3 = arith.constant 3 : index
    %c0_62 = arith.constant 0 : index
    %c0_63 = arith.constant 0 : index
    %80 = vector.load %arg8[%c3, %c0_62, %c0_63] : memref<4x128x128xbf16, #tpu.memory_space<vmem>>, vector<1x128x128xbf16>
    %81 = vector.shape_cast %80 : vector<1x128x128xbf16> to vector<128x128xbf16>
    %cst_64 = arith.constant dense<0.000000e+00> : vector<16x128xf32>
    %82 = tpu.matmul %79, %81, %cst_64 {dimension_numbers = #tpu.dot_dimension_numbers<[1], [0], [0], [1], [0, 0, 1, 1], [], []>} : vector<16x128xbf16>, vector<128x128xbf16>, vector<16x128xf32> -> vector<16x128xf32>
    %c3_65 = arith.constant 3 : index
    %c0_66 = arith.constant 0 : index
    %c0_67 = arith.constant 0 : index
    %83 = vector.load %arg9[%c3_65, %c0_66, %c0_67] : memref<4x1x128xf32, #tpu.memory_space<vmem>>, vector<1x1x128xf32>
    %84 = vector.shape_cast %83 : vector<1x1x128xf32> to vector<1x128xf32>
    %85 = vector.broadcast %84 : vector<1x128xf32> to vector<16x128xf32>
    %86 = arith.addf %82, %85 : vector<16x128xf32>
    %c0_68 = arith.constant 0 : index
    %c0_69 = arith.constant 0 : index
    %87 = vector.load %arg10[%c0_68, %c0_69] : memref<16x128xf32, #tpu.memory_space<vmem>>, vector<16x128xf32>
    tpu.vector_store %arg10[%c0_68, %c0_69], %86 {strides = array<i32>} : memref<16x128xf32, #tpu.memory_space<vmem>>, vector<16x128xf32>,
    return
  }
}

</mosaic_0001>

<bundles_post_ra>
// kernel: gnn_vision_mlp_forward.1
= control target key start
LH: loop header
LB: loop body
LE: loop exit
PB: predicated region body
PF: predicated region fallthrough
CT: control target
= control target key end

     0   :  { %15 = vsyncpa [#allocation3], 0  ;;  %s2103_s0 = inlined_call_operand.vmem [shape: bf16[16,16], index: 0, kind: input, shape index: {}]   ;;  %s2104_s1 = inlined_call_operand.vmem [shape: bf16[16,128], index: 1, kind: input, shape index: {}]   ;;  %s2105_s2 = inlined_call_operand.vmem [shape: bf16[16,128], index: 2, kind: input, shape index: {}]   ;;  %s2106_s3 = inlined_call_operand.hbm [shape: bf16[3,128,128], index: 3, kind: input, shape index: {}]   ;;  %s2107_s4 = inlined_call_operand.vmem [shape: f32[3,1,128], index: 4, kind: input, shape index: {}]   ;;  %s2108_s5 = inlined_call_operand.hbm [shape: bf16[128,128], index: 5, kind: input, shape index: {}]   ;;  %s2109_s6 = inlined_call_operand.hbm [shape: bf16[128,128], index: 6, kind: input, shape index: {}]   ;;  %s2110_s7 = inlined_call_operand.vmem [shape: f32[1,128], index: 7, kind: input, shape index: {}]   ;;  %s2111_s8 = inlined_call_operand.hbm [shape: bf16[4,128,128], index: 8, kind: input, shape index: {}]   ;;  %s2112_s9 = inlined_call_operand.vmem [shape: f32[4,1,128], index: 9, kind: input, shape index: {}]   ;;  %s2113_s10 = inlined_call_operand.hbm [shape: f32[16,128], index: 10, kind: output, shape index: {}]  }
   0x1   :  { %16 = vsyncpa [#allocation6], 0 }
   0x2   :  { %17 = vsyncpa [#allocation9], 0 }
   0x3   :  { %18 = vsyncpa [#allocation4], 0  ;;  %s1870_s13 = smov [#allocation5]   ;;  %s1871_s15 = smov [#allocation2]  }
   0x4   :  { %s44_s14 = sshll.u32 %s1870_s13, 4  ;;  %s30_s16 = sshll.u32 %s1871_s15, 4  ;;  %s45_s14 = int_to_ptr.vmem [resolvable:$true] %s44_s14  ;;  %s31_s16 = int_to_ptr.vmem [resolvable:$true] %s30_s16 }
   0x5   :  { %s1770_s17 = scalar_lea.vmem %s45_s14, 1024  ;;  %p1775_p1 = scmp.lt.s32.totalorder %s45_s14, %s45_s14 }
   0x6   :  { %p1771_p0 = scmp.ne.s32.totalorder %s45_s14, %s1770_s17  ;;  %p1776_p2 = scmp.lt.s32.totalorder %s1770_s17, %s1770_s17 }
   0x8   :  { %p1777_p3 = por %p1776_p2, %p1775_p1 }
   0xa   :  { %p1778_p4 = pnand %p1777_p3, %p1771_p0 }
   0xc   :  { %1781 = shalt.err (!%p1778_p4)
}
   0xd   :  { %s1872_s18 = smov 64   ;;  %s1873_s19 = smov 4  }
   0xe   :  { %50 = dma.hbm_to_vmem [thread:$0]  %s2108_s5, 1024, %s45_s14, [#allocation6], %s1872_s18, %s1872_s18, %s1873_s19  }
   0xf   :  { %s1790_s22 = scalar_lea.vmem %s31_s16, 3072  ;;  %p1795_p6 = scmp.lt.s32.totalorder %s31_s16, %s31_s16 }
  0x10   :  { %p1791_p5 = scmp.ne.s32.totalorder %s31_s16, %s1790_s22  ;;  %p1796_p7 = scmp.lt.s32.totalorder %s1790_s22, %s1790_s22 }
  0x12   :  { %p1797_p8 = por %p1796_p7, %p1795_p6 }
  0x14   :  { %p1798_p9 = pnand %p1797_p8, %p1791_p5 }
  0x16   :  { %1801 = shalt.err (!%p1798_p9)
}
  0x17   :  { %36 = dma.hbm_to_vmem [thread:$0]  %s2106_s3, 3072, %s31_s16, [#allocation3], %s1872_s18, %s1872_s18, %s1873_s19  }
  0x18   :  { %s1874_s25 = smov [#allocation7]   ;;  %s1875_s27 = smov [#allocation8]  }
  0x19   :  { %s56_s26 = sshll.u32 %s1874_s25, 4  ;;  %s70_s28 = sshll.u32 %s1875_s27, 4  ;;  %s57_s26 = int_to_ptr.vmem [resolvable:$true] %s56_s26  ;;  %s71_s28 = int_to_ptr.vmem [resolvable:$true] %s70_s28 }
  0x1a   :  { %s1810_s5 = scalar_lea.vmem %s57_s26, 1024  ;;  %p1815_p11 = scmp.lt.s32.totalorder %s57_s26, %s57_s26 }
  0x1b   :  { %p1811_p10 = scmp.ne.s32.totalorder %s57_s26, %s1810_s5  ;;  %p1816_p12 = scmp.lt.s32.totalorder %s1810_s5, %s1810_s5 }
  0x1d   :  { %p1817_p13 = por %p1816_p12, %p1815_p11 }
  0x1f   :  { %p1818_p0 = pnand %p1817_p13, %p1811_p10 }
  0x21   :  { %1821 = shalt.err (!%p1818_p0)
}
  0x22   :  { %62 = dma.hbm_to_vmem [thread:$0]  %s2109_s6, 1024, %s57_s26, [#allocation6], %s1872_s18, %s1872_s18, %s1873_s19  }
  0x23   :  { %s1830_s3 = scalar_lea.vmem %s71_s28, 4096  ;;  %p1835_p2 = scmp.lt.s32.totalorder %s71_s28, %s71_s28 }
  0x24   :  { %p1831_p1 = scmp.ne.s32.totalorder %s71_s28, %s1830_s3  ;;  %p1836_p3 = scmp.lt.s32.totalorder %s1830_s3, %s1830_s3 }
  0x26   :  { %p1837_p4 = por %p1836_p3, %p1835_p2 }
  0x28   :  { %p1838_p5 = pnand %p1837_p4, %p1831_p1 }
  0x2a   :  { %1841 = shalt.err (!%p1838_p5)
}
  0x2b   :  { %76 = dma.hbm_to_vmem [thread:$0]  %s2111_s8, 4096, %s71_s28, [#allocation9], %s1872_s18, %s1872_s18, %s1873_s19  }
  0x2c   :  { %1862 = dma.done.wait [#allocation3], 3072  }
  0x2d   :  { %1863 = vsyncadd [#allocation3], 4294964224 }
  0x2e   :  { %1864 = dma.done.wait [#allocation6], 2048  }
  0x2f   :  { %1865 = vsyncadd [#allocation6], 4294965248 }
  0x30   :  { %1866 = dma.done.wait [#allocation9], 4096  }
  0x31   :  { %1867 = vsyncadd [#allocation9], 4294963200  ;;  %v1876_v0 = vmov 0.0   ;;  %vm1877_vm0 = vmmov 0   ;;  %v1687_v1 = vld [vmem:[%s2104_s1] sm:$0xff]   ;;  %vm107_vm1 = vcmask 130048  }
  0x32   :  { %1478 = vmatprep.subr.bf16.mxu0 %v1876_v0  ;;  %1480 = vmatprep.mubr.msk.bf16.mxu0 %vm1877_vm0, %v1876_v0  ;;  %v1972_v2 = vld [vmem:[%s2103_s0] sm:$0xff]   ;;  %v1689_v3 = vld [vmem:[#allocation2 + $0x38] sm:$0xff]   ;;  %v1690_v4 = vld [vmem:[#allocation2 + $0x30] sm:$0xff]   ;;  %s1878_s28 = smov [#allocation10]  }
  0x33   :  { %1484 = vmatprep.subr.bf16.mxu1 %v1876_v0  ;;  %1500 = vmatprep.mubr.msk.bf16.mxu1 %vm1877_vm0, %v1876_v0  ;;  %v1691_v5 = vld [vmem:[#allocation2 + $0x28] sm:$0xff]   ;;  %v1692_v6 = vld [vmem:[#allocation2 + $0x20] sm:$0xff]   ;;  %v1693_v7 = vld [vmem:[#allocation2 + $0x18] sm:$0xff]   ;;  %s1286_s5 = sshll.u32 %s1878_s28, 4  ;;  %s1287_s5 = int_to_ptr.vmem [resolvable:$true] %s1286_s5 }
  0x34   :  { %1479 = vmatpush3.bf16.msra.mxu0 %v1687_v1  ;;  %1485 = vmatpush3.bf16.msra.mxu1 %v1689_v3  ;;  %v1694_v8 = vld [vmem:[#allocation2 + $0x10] sm:$0xff]   ;;  %v1695_v9 = vld [vmem:[#allocation2 + $0x8] sm:$0xff]   ;;  %v1696_v10 = vld [vmem:[#allocation2] sm:$0xff]   ;;  %s1842_s29 = scalar_lea.vmem %s1287_s5, 256  ;;  %p1847_p7 = scmp.lt.s32.totalorder %s1287_s5, %s1287_s5 }
  0x35   :  { %1504 = vmatprep.subr.bf16.mxu0 %v1876_v0  ;;  %1486 = vmatprep.subr.bf16.mxu1 %v1876_v0  ;;  %v1303_v16 = vld [vmem:[%s2107_s4] ss:$0 sm:$0xff]  ;;  %v1697_v26 = vld [vmem:[#allocation2 + $0x78] sm:$0xff]   ;;  %v1698_v27 = vld [vmem:[#allocation2 + $0x70] sm:$0xff]   ;;  %p1843_p6 = scmp.ne.s32.totalorder %s1287_s5, %s1842_s29  ;;  %p1848_p8 = scmp.lt.s32.totalorder %s1842_s29, %s1842_s29 }
  0x36   :  { %v1699_v28 = vld [vmem:[#allocation2 + $0x68] sm:$0xff]   ;;  %v1700_v29 = vld [vmem:[#allocation2 + $0x60] sm:$0xff]   ;;  %v1701_v30 = vld [vmem:[#allocation2 + $0x58] sm:$0xff]  }
  0x37   :  { %1481 = vmatmul.mubr.msk.bf16.vlgmr.msra.gmra.mxu0 %vm107_vm1, %v1972_v2  ;;  %v1702_v31 = vld [vmem:[#allocation2 + $0x50] sm:$0xff]   ;;  %v1703_v32 = vld [vmem:[#allocation2 + $0x48] sm:$0xff]   ;;  %v1704_v33 = vld [vmem:[#allocation2 + $0x40] sm:$0xff]   ;;  %p1849_p9 = por %p1848_p8, %p1847_p7 }
  0x38   :  { %1506 = vmatprep.mubr.msk.bf16.mxu0 %vm1877_vm0, %v1876_v0  ;;  %1487 = vmatpush3.bf16.msra.mxu1 %v1690_v4  ;;  %v1705_v39 = vld [vmem:[#allocation2 + $0xb8] sm:$0xff]   ;;  %v1706_v40 = vld [vmem:[#allocation2 + $0xb0] sm:$0xff]   ;;  %v1707_v41 = vld [vmem:[#allocation2 + $0xa8] sm:$0xff]  }
  0x39   :  { %1488 = vmatprep.subr.bf16.mxu1 %v1876_v0  ;;  %v1708_v42 = vld [vmem:[#allocation2 + $0xa0] sm:$0xff]   ;;  %v1709_v43 = vld [vmem:[#allocation2 + $0x98] sm:$0xff]   ;;  %v1710_v44 = vld [vmem:[#allocation2 + $0x90] sm:$0xff]   ;;  %p1850_p10 = pnand %p1849_p9, %p1843_p6 }
  0x3a   :  { %v1314_v45 = vld [vmem:[%s2107_s4 + $0x1] ss:$0 sm:$0xff]  ;;  %v1711_v55 = vld [vmem:[#allocation2 + $0x88] sm:$0xff]   ;;  %v1713_v57 = vld [vmem:[#allocation7 + $0x38] sm:$0xff]  }
  0x3b   :  { %v1712_v56 = vld [vmem:[#allocation2 + $0x80] sm:$0xff]   ;;  %v1715_v58 = vld [vmem:[#allocation7 + $0x30] sm:$0xff]   ;;  %v1717_v59 = vld [vmem:[#allocation7 + $0x28] sm:$0xff]  }
  0x3c   :  { %1489 = vmatpush3.bf16.msra.mxu1 %v1691_v5  ;;  %v1719_v60 = vld [vmem:[#allocation7 + $0x20] sm:$0xff]   ;;  %v1721_v61 = vld [vmem:[#allocation7 + $0x18] sm:$0xff]   ;;  %v1723_v62 = vld [vmem:[#allocation7 + $0x10] sm:$0xff]  }
  0x3d   :  { %1490 = vmatprep.subr.bf16.mxu1 %v1876_v0  ;;  %v1714_v3 = vld [vmem:[#allocation5 + $0x38] sm:$0xff]  }
  0x40   :  { %1491 = vmatpush3.bf16.msra.mxu1 %v1692_v6  ;;  %v1716_v6 = vld [vmem:[#allocation5 + $0x30] sm:$0xff]  }
  0x41   :  { %1492 = vmatprep.subr.bf16.mxu1 %v1876_v0 }
  0x44   :  { %1493 = vmatpush3.bf16.msra.mxu1 %v1693_v7  ;;  %v1718_v7 = vld [vmem:[#allocation5 + $0x28] sm:$0xff]  }
  0x45   :  { %1494 = vmatprep.subr.bf16.mxu1 %v1876_v0 }
  0x48   :  { %1495 = vmatpush3.bf16.msra.mxu1 %v1694_v8  ;;  %v1720_v8 = vld [vmem:[#allocation5 + $0x20] sm:$0xff]  }
  0x49   :  { %1496 = vmatprep.subr.bf16.mxu1 %v1876_v0 }
  0x4c   :  { %1497 = vmatpush3.bf16.msra.mxu1 %v1695_v9  ;;  %v1722_v9 = vld [vmem:[#allocation5 + $0x18] sm:$0xff]  }
  0x4d   :  { %1498 = vmatprep.subr.bf16.mxu1 %v1876_v0 }
  0x50   :  { %1499 = vmatpush3.bf16.msra.mxu1 %v1696_v10  ;;  %v1725_v10 = vld [vmem:[#allocation7 + $0x8] sm:$0xff]  }
  0x51   :  { %1536 = vmatprep.subr.bf16.mxu1 %v1876_v0 }
  0xf7   :  { %v145_v11 = vpop.f32.mrf.mxu0 }
  0xf9   :  { %v1482_v12 = vpop.f32.mrf.mxu0 }
  0xfa   :  { %v1727_v12 = vld [vmem:[#allocation7] sm:$0xff]  }
  0xfb   :  { %v148_v13 = vpop.f32.mrf.mxu0 }
  0xfc   :  { %v152_v14 = vpack.c.bf16 %v148_v13, %v145_v11  ;;  %v1724_v11 = vld [vmem:[#allocation5 + $0x10] sm:$0xff]   ;;  %v1726_v13 = vld [vmem:[#allocation5 + $0x8] sm:$0xff]  }
  0xfd   :  { %v1483_v15 = vpop.f32.mrf.mxu0 }
  0xfe   :  { %1501 = vmatmul.mubr.bf16.vlgmr.msra.gmra.mxu1 %v152_v14  ;;  %v1729_v14 = vld [vmem:[%s2105_s2] sm:$0xff]  }
  0xff   :  { %1552 = vmatprep.mubr.msk.bf16.mxu1 %vm1877_vm0, %v1876_v0  ;;  %1537 = vmatpush3.bf16.msra.mxu1 %v1705_v39  ;;  %v1728_v15 = vld [vmem:[#allocation5] sm:$0xff]   ;;  %v1739_v39 = vld [vmem:[#allocation8 + $0x70] sm:$0xff]  }
 0x100   :  { %1538 = vmatprep.subr.bf16.mxu1 %v1876_v0 }
 0x103   :  { %1539 = vmatpush3.bf16.msra.mxu1 %v1706_v40  ;;  %v1740_v40 = vld [vmem:[#allocation8 + $0x68] sm:$0xff]  }
 0x104   :  { %1540 = vmatprep.subr.bf16.mxu1 %v1876_v0 }
 0x107   :  { %1541 = vmatpush3.bf16.msra.mxu1 %v1707_v41  ;;  %v1741_v41 = vld [vmem:[#allocation8 + $0x60] sm:$0xff]  }
 0x108   :  { %1542 = vmatprep.subr.bf16.mxu1 %v1876_v0 }
 0x10b   :  { %1543 = vmatpush3.bf16.msra.mxu1 %v1708_v42  ;;  %v1742_v42 = vld [vmem:[#allocation8 + $0x58] sm:$0xff]  }
 0x10c   :  { %1544 = vmatprep.subr.bf16.mxu1 %v1876_v0 }
 0x10f   :  { %1545 = vmatpush3.bf16.msra.mxu1 %v1709_v43 }
 0x110   :  { %1546 = vmatprep.subr.bf16.mxu1 %v1876_v0 }
 0x113   :  { %1547 = vmatpush3.bf16.msra.mxu1 %v1710_v44 }
 0x114   :  { %1548 = vmatprep.subr.bf16.mxu1 %v1876_v0 }
 0x117   :  { %1549 = vmatpush3.bf16.msra.mxu1 %v1711_v55  ;;  %v1743_v55 = vld [vmem:[#allocation8 + $0x50] sm:$0xff]  }
 0x118   :  { %1550 = vmatprep.subr.bf16.mxu1 %v1876_v0 }
 0x11b   :  { %1551 = vmatpush3.bf16.msra.mxu1 %v1712_v56  ;;  %v1744_v56 = vld [vmem:[#allocation8 + $0x48] sm:$0xff]  }
 0x11c   :  { %1576 = vmatprep.subr.bf16.mxu1 %v1876_v0 }
 0x1be   :  { %v258_v17 = vpop.f32.mrf.mxu1 }
 0x1bf   :  { %v259_v19 = vadd.f32 %v1303_v16, %v258_v17  ;;  %v1731_v17 = vld [vmem:[#allocation8 + $0x30] sm:$0xff]  }
 0x1c0   :  { %v1502_v18 = vpop.f32.mrf.mxu1 }
 0x1c1   :  { %v265_v23 = vmax.f32 %v259_v19, 0.0  ;;  %v1732_v18 = vld [vmem:[#allocation8 + $0x28] sm:$0xff]   ;;  %v1733_v19 = vld [vmem:[#allocation8 + $0x20] sm:$0xff]  }
 0x1c2   :  { %v261_v20 = vpop.f32.mrf.mxu1 }
 0x1c3   :  { %v262_v21 = vadd.f32 %v1303_v16, %v261_v20  ;;  %v1730_v16 = vld [vmem:[#allocation8 + $0x38] sm:$0xff]  }
 0x1c4   :  { %v1503_v22 = vpop.f32.mrf.mxu1  ;;  %v1734_v20 = vld [vmem:[#allocation8 + $0x18] sm:$0xff]  }
 0x1c5   :  { %v266_v24 = vmax.f32 %v262_v21, 0.0  ;;  %v1325_v21 = vld [vmem:[%s2107_s4 + $0x2] ss:$0 sm:$0xff] }
 0x1c7   :  { %v267_v25 = vpack.c.bf16 %v266_v24, %v265_v23 }
 0x1c9   :  { %1505 = vmatpush3.bf16.msra.mxu0 %v267_v25 }
 0x1ca   :  { %1510 = vmatprep.subr.bf16.mxu0 %v1876_v0 }
 0x1cc   :  { %1507 = vmatmul.mubr.msk.bf16.vlgmr.msra.gmra.mxu0 %vm107_vm1, %v1972_v2 }
 0x1cd   :  { %1511 = vmatpush3.bf16.msra.mxu0 %v1697_v26  ;;  %1526 = vmatprep.mubr.msk.bf16.mxu0 %vm1877_vm0, %v1876_v0 }
 0x1ce   :  { %1512 = vmatprep.subr.bf16.mxu0 %v1876_v0 }
 0x1d1   :  { %1513 = vmatpush3.bf16.msra.mxu0 %v1698_v27 }
 0x1d2   :  { %1514 = vmatprep.subr.bf16.mxu0 %v1876_v0 }
 0x1d5   :  { %1515 = vmatpush3.bf16.msra.mxu0 %v1699_v28 }
 0x1d6   :  { %1516 = vmatprep.subr.bf16.mxu0 %v1876_v0 }
 0x1d9   :  { %1517 = vmatpush3.bf16.msra.mxu0 %v1700_v29 }
 0x1da   :  { %1518 = vmatprep.subr.bf16.mxu0 %v1876_v0 }
 0x1dd   :  { %1519 = vmatpush3.bf16.msra.mxu0 %v1701_v30 }
 0x1de   :  { %1520 = vmatprep.subr.bf16.mxu0 %v1876_v0 }
 0x1e1   :  { %1521 = vmatpush3.bf16.msra.mxu0 %v1702_v31 }
 0x1e2   :  { %1522 = vmatprep.subr.bf16.mxu0 %v1876_v0 }
 0x1e5   :  { %1523 = vmatpush3.bf16.msra.mxu0 %v1703_v32 }
 0x1e6   :  { %1524 = vmatprep.subr.bf16.mxu0 %v1876_v0 }
 0x1e9   :  { %1525 = vmatpush3.bf16.msra.mxu0 %v1704_v33 }
 0x1ea   :  { %1530 = vmatprep.subr.bf16.mxu0 %v1876_v0 }
 0x28c   :  { %v302_v34 = vpop.f32.mrf.mxu0 }
 0x28e   :  { %v1508_v35 = vpop.f32.mrf.mxu0 }
 0x290   :  { %v305_v36 = vpop.f32.mrf.mxu0 }
 0x291   :  { %v309_v37 = vpack.c.bf16 %v305_v36, %v302_v34  ;;  %v1735_v34 = vld [vmem:[#allocation8 + $0x10] sm:$0xff]   ;;  %v1736_v36 = vld [vmem:[#allocation8 + $0x8] sm:$0xff]  }
 0x292   :  { %v1509_v38 = vpop.f32.mrf.mxu0 }
 0x293   :  { %1527 = vmatmul.mubr.bf16.vlgmr.msra.gmra.mxu0 %v309_v37  ;;  %v1737_v37 = vld [vmem:[#allocation8] sm:$0xff]   ;;  %v1738_v38 = vld [vmem:[#allocation8 + $0x78] sm:$0xff]  }
 0x294   :  { %1532 = vmatprep.mubr.msk.bf16.mxu0 %vm1877_vm0, %v1876_v0 }
 0x353   :  { %v417_v46 = vpop.f32.mrf.mxu0 }
 0x354   :  { %v418_v48 = vadd.f32 %v1314_v45, %v417_v46 }
 0x355   :  { %v1528_v47 = vpop.f32.mrf.mxu0 }
 0x356   :  { %v424_v52 = vmax.f32 %v418_v48, 0.0 }
 0x357   :  { %v420_v49 = vpop.f32.mrf.mxu0 }
 0x358   :  { %v421_v50 = vadd.f32 %v1314_v45, %v420_v49  ;;  %v1351_v45 = vld [vmem:[%s2110_s7] ss:$0 sm:$0xff] }
 0x359   :  { %v1529_v51 = vpop.f32.mrf.mxu0 }
 0x35a   :  { %v425_v53 = vmax.f32 %v421_v50, 0.0 }
 0x35c   :  { %v426_v54 = vpack.c.bf16 %v425_v53, %v424_v52 }
 0x35e   :  { %1531 = vmatpush3.bf16.msra.mxu0 %v426_v54 }
 0x35f   :  { %1556 = vmatprep.subr.bf16.mxu0 %v1876_v0 }
 0x361   :  { %1533 = vmatmul.mubr.msk.bf16.vlgmr.msra.gmra.mxu0 %vm107_vm1, %v1972_v2 }
 0x362   :  { %1572 = vmatprep.mubr.msk.bf16.mxu0 %vm1877_vm0, %v1876_v0  ;;  %1557 = vmatpush3.bf16.msra.mxu0 %v1713_v57  ;;  %v1745_v57 = vld [vmem:[#allocation8 + $0x40] sm:$0xff]  }
 0x363   :  { %1558 = vmatprep.subr.bf16.mxu0 %v1876_v0 }
 0x366   :  { %1559 = vmatpush3.bf16.msra.mxu0 %v1715_v58  ;;  %v1746_v58 = vld [vmem:[#allocation8 + $0xb8] sm:$0xff]  }
 0x367   :  { %1560 = vmatprep.subr.bf16.mxu0 %v1876_v0 }
 0x36a   :  { %1561 = vmatpush3.bf16.msra.mxu0 %v1717_v59  ;;  %v1747_v59 = vld [vmem:[#allocation8 + $0xb0] sm:$0xff]  }
 0x36b   :  { %1562 = vmatprep.subr.bf16.mxu0 %v1876_v0 }
 0x36e   :  { %1563 = vmatpush3.bf16.msra.mxu0 %v1719_v60  ;;  %v1748_v60 = vld [vmem:[#allocation8 + $0xa8] sm:$0xff]  }
 0x36f   :  { %1564 = vmatprep.subr.bf16.mxu0 %v1876_v0 }
 0x372   :  { %1565 = vmatpush3.bf16.msra.mxu0 %v1721_v61  ;;  %v1749_v61 = vld [vmem:[#allocation8 + $0xa0] sm:$0xff]  }
 0x373   :  { %1566 = vmatprep.subr.bf16.mxu0 %v1876_v0 }
 0x376   :  { %1567 = vmatpush3.bf16.msra.mxu0 %v1723_v62  ;;  %v1750_v62 = vld [vmem:[#allocation8 + $0x98] sm:$0xff]  }
 0x377   :  { %1568 = vmatprep.subr.bf16.mxu0 %v1876_v0 }
 0x37a   :  { %1569 = vmatpush3.bf16.msra.mxu0 %v1725_v10  ;;  %v1751_v10 = vld [vmem:[#allocation8 + $0x90] sm:$0xff]  }
 0x37b   :  { %1570 = vmatprep.subr.bf16.mxu0 %v1876_v0 }
 0x37e   :  { %1571 = vmatpush3.bf16.msra.mxu0 %v1727_v12  ;;  %v1753_v12 = vld [vmem:[#allocation8 + $0x80] sm:$0xff]  }
 0x37f   :  { %1596 = vmatprep.subr.bf16.mxu0 %v1876_v0 }
 0x381   :  { %1573 = vmatmul.mubr.bf16.vlgmr.msra.gmra.mxu0 %v1729_v14  ;;  %v1755_v14 = vld [vmem:[#allocation8 + $0xf0] sm:$0xff]  }
 0x382   :  { %1612 = vmatprep.mubr.msk.bf16.mxu0 %vm1877_vm0, %v1876_v0  ;;  %1597 = vmatpush3.bf16.msra.mxu0 %v1730_v16  ;;  %v1757_v16 = vld [vmem:[#allocation8 + $0xe0] sm:$0xff]  }
 0x383   :  { %1598 = vmatprep.subr.bf16.mxu0 %v1876_v0 }
 0x386   :  { %1599 = vmatpush3.bf16.msra.mxu0 %v1731_v17  ;;  %v1758_v17 = vld [vmem:[#allocation8 + $0xd8] sm:$0xff]  }
 0x387   :  { %1600 = vmatprep.subr.bf16.mxu0 %v1876_v0 }
 0x38a   :  { %1601 = vmatpush3.bf16.msra.mxu0 %v1732_v18  ;;  %v1362_v18 = vld [vmem:[%s2112_s9 + $0x1] ss:$0 sm:$0xff] }
 0x38b   :  { %1602 = vmatprep.subr.bf16.mxu0 %v1876_v0 }
 0x38e   :  { %1603 = vmatpush3.bf16.msra.mxu0 %v1733_v19 }
 0x38f   :  { %1604 = vmatprep.subr.bf16.mxu0 %v1876_v0 }
 0x392   :  { %1605 = vmatpush3.bf16.msra.mxu0 %v1734_v20 }
 0x393   :  { %1606 = vmatprep.subr.bf16.mxu0 %v1876_v0 }
 0x396   :  { %1607 = vmatpush3.bf16.msra.mxu0 %v1735_v34 }
 0x397   :  { %1608 = vmatprep.subr.bf16.mxu0 %v1876_v0 }
 0x39a   :  { %1609 = vmatpush3.bf16.msra.mxu0 %v1736_v36 }
 0x39b   :  { %1610 = vmatprep.subr.bf16.mxu0 %v1876_v0 }
 0x39e   :  { %1611 = vmatpush3.bf16.msra.mxu0 %v1737_v37 }
 0x39f   :  { %1636 = vmatprep.subr.bf16.mxu0 %v1876_v0 }
 0x421   :  { %v461_v63 = vpop.f32.mrf.mxu0 }
 0x423   :  { %v1534_v1 = vpop.f32.mrf.mxu0 }
 0x425   :  { %v464_v2 = vpop.f32.mrf.mxu0 }
 0x426   :  { %v468_v4 = vpack.c.bf16 %v464_v2, %v461_v63  ;;  %v1352_v63 = vld [vmem:[%s2112_s9] ss:$0 sm:$0xff] }
 0x427   :  { %v1535_v5 = vpop.f32.mrf.mxu0 }
 0x428   :  { %1553 = vmatmul.mubr.bf16.vlgmr.msra.gmra.mxu1 %v468_v4 }
 0x429   :  { %1577 = vmatpush3.bf16.msra.mxu1 %v1714_v3  ;;  %1592 = vmatprep.mubr.msk.bf16.mxu1 %vm1877_vm0, %v1876_v0 }
 0x42a   :  { %1578 = vmatprep.subr.bf16.mxu1 %v1876_v0 }
 0x42d   :  { %1579 = vmatpush3.bf16.msra.mxu1 %v1716_v6 }
 0x42e   :  { %1580 = vmatprep.subr.bf16.mxu1 %v1876_v0 }
 0x431   :  { %1581 = vmatpush3.bf16.msra.mxu1 %v1718_v7 }
 0x432   :  { %1582 = vmatprep.subr.bf16.mxu1 %v1876_v0 }
 0x435   :  { %1583 = vmatpush3.bf16.msra.mxu1 %v1720_v8 }
 0x436   :  { %1584 = vmatprep.subr.bf16.mxu1 %v1876_v0 }
 0x439   :  { %1585 = vmatpush3.bf16.msra.mxu1 %v1722_v9 }
 0x43a   :  { %1586 = vmatprep.subr.bf16.mxu1 %v1876_v0 }
 0x43d   :  { %1587 = vmatpush3.bf16.msra.mxu1 %v1724_v11  ;;  %v1752_v11 = vld [vmem:[#allocation8 + $0x88] sm:$0xff]  }
 0x43e   :  { %1588 = vmatprep.subr.bf16.mxu1 %v1876_v0 }
 0x441   :  { %1589 = vmatpush3.bf16.msra.mxu1 %v1726_v13  ;;  %v708_v31 = vpop.f32.mrf.mxu0  ;;  %v1754_v13 = vld [vmem:[#allocation8 + $0xf8] sm:$0xff]  }
 0x442   :  { %1590 = vmatprep.subr.bf16.mxu1 %v1876_v0 }
 0x443   :  { %v1574_v32 = vpop.f32.mrf.mxu0 }
 0x445   :  { %1591 = vmatpush3.bf16.msra.mxu1 %v1728_v15  ;;  %v711_v33 = vpop.f32.mrf.mxu0  ;;  %v1756_v15 = vld [vmem:[#allocation8 + $0xe8] sm:$0xff]  }
 0x446   :  { %1616 = vmatprep.subr.bf16.mxu1 %v1876_v0 }
 0x447   :  { %v1575_v35 = vpop.f32.mrf.mxu0 }
 0x4e8   :  { %v576_v22 = vpop.f32.mrf.mxu1 }
 0x4e9   :  { %v577_v24 = vadd.f32 %v1325_v21, %v576_v22 }
 0x4ea   :  { %v1554_v23 = vpop.f32.mrf.mxu1 }
 0x4eb   :  { %v583_v28 = vmax.f32 %v577_v24, 0.0 }
 0x4ec   :  { %v579_v25 = vpop.f32.mrf.mxu1 }
 0x4ed   :  { %v580_v26 = vadd.f32 %v1325_v21, %v579_v25 }
 0x4ee   :  { %v1555_v27 = vpop.f32.mrf.mxu1 }
 0x4ef   :  { %v584_v29 = vmax.f32 %v580_v26, 0.0 }
 0x4f1   :  { %v585_v30 = vpack.c.bf16 %v584_v29, %v583_v28  ;;  %v1759_v28 = vld [vmem:[#allocation8 + $0xd0] sm:$0xff]   ;;  %v1760_v29 = vld [vmem:[#allocation8 + $0xc8] sm:$0xff]  }
 0x4f3   :  { %1593 = vmatmul.mubr.bf16.vlgmr.msra.gmra.mxu1 %v585_v30  ;;  %v1761_v30 = vld [vmem:[#allocation8 + $0xc0] sm:$0xff]  }
 0x4f4   :  { %1632 = vmatprep.mubr.msk.bf16.mxu1 %vm1877_vm0, %v1876_v0  ;;  %1617 = vmatpush3.bf16.msra.mxu1 %v1738_v38 }
 0x4f5   :  { %1618 = vmatprep.subr.bf16.mxu1 %v1876_v0 }
 0x4f8   :  { %1619 = vmatpush3.bf16.msra.mxu1 %v1739_v39 }
 0x4f9   :  { %1620 = vmatprep.subr.bf16.mxu1 %v1876_v0 }
 0x4fc   :  { %1621 = vmatpush3.bf16.msra.mxu1 %v1740_v40 }
 0x4fd   :  { %1622 = vmatprep.subr.bf16.mxu1 %v1876_v0 }
 0x500   :  { %1623 = vmatpush3.bf16.msra.mxu1 %v1741_v41 }
 0x501   :  { %1624 = vmatprep.subr.bf16.mxu1 %v1876_v0 }
 0x504   :  { %1625 = vmatpush3.bf16.msra.mxu1 %v1742_v42 }
 0x505   :  { %1626 = vmatprep.subr.bf16.mxu1 %v1876_v0 }
 0x508   :  { %1627 = vmatpush3.bf16.msra.mxu1 %v1743_v55 }
 0x509   :  { %1628 = vmatprep.subr.bf16.mxu1 %v1876_v0 }
 0x50c   :  { %1629 = vmatpush3.bf16.msra.mxu1 %v1744_v56 }
 0x50d   :  { %1630 = vmatprep.subr.bf16.mxu1 %v1876_v0 }
 0x510   :  { %1631 = vmatpush3.bf16.msra.mxu1 %v1745_v57 }
 0x511   :  { %1656 = vmatprep.subr.bf16.mxu1 %v1876_v0 }
 0x5b3   :  { %v797_v43 = vpop.f32.mrf.mxu1 }
 0x5b4   :  { %v798_v44 = vadd.f32 %v797_v43, %v708_v31  ;;  %v1372_v31 = vld [vmem:[%s2112_s9 + $0x2] ss:$0 sm:$0xff] }
 0x5b5   :  { %v1594_v46 = vpop.f32.mrf.mxu1 }
 0x5b6   :  { %v811_v48 = vadd.f32 %v1351_v45, %v798_v44 }
 0x5b7   :  { %v800_v47 = vpop.f32.mrf.mxu1 }
 0x5b8   :  { %v801_v49 = vadd.f32 %v800_v47, %v711_v33  ;;  %v813_v52 = vmax.f32 %v811_v48, 0.0 }
 0x5b9   :  { %v1595_v50 = vpop.f32.mrf.mxu1 }
 0x5ba   :  { %v812_v51 = vadd.f32 %v1351_v45, %v801_v49 }
 0x5bc   :  { %v814_v53 = vmax.f32 %v812_v51, 0.0 }
 0x5be   :  { %v815_v54 = vpack.c.bf16 %v814_v53, %v813_v52 }
 0x5c0   :  { %1613 = vmatmul.mubr.bf16.vlgmr.msra.gmra.mxu0 %v815_v54 }
 0x5c1   :  { %1652 = vmatprep.mubr.msk.bf16.mxu0 %vm1877_vm0, %v1876_v0  ;;  %1637 = vmatpush3.bf16.msra.mxu0 %v1746_v58 }
 0x5c2   :  { %1638 = vmatprep.subr.bf16.mxu0 %v1876_v0 }
 0x5c5   :  { %1639 = vmatpush3.bf16.msra.mxu0 %v1747_v59 }
 0x5c6   :  { %1640 = vmatprep.subr.bf16.mxu0 %v1876_v0 }
 0x5c9   :  { %1641 = vmatpush3.bf16.msra.mxu0 %v1748_v60 }
 0x5ca   :  { %1642 = vmatprep.subr.bf16.mxu0 %v1876_v0 }
 0x5cd   :  { %1643 = vmatpush3.bf16.msra.mxu0 %v1749_v61 }
 0x5ce   :  { %1644 = vmatprep.subr.bf16.mxu0 %v1876_v0 }
 0x5d1   :  { %1645 = vmatpush3.bf16.msra.mxu0 %v1750_v62 }
 0x5d2   :  { %1646 = vmatprep.subr.bf16.mxu0 %v1876_v0 }
 0x5d5   :  { %1647 = vmatpush3.bf16.msra.mxu0 %v1751_v10 }
 0x5d6   :  { %1648 = vmatprep.subr.bf16.mxu0 %v1876_v0 }
 0x5d9   :  { %1649 = vmatpush3.bf16.msra.mxu0 %v1752_v11 }
 0x5da   :  { %1650 = vmatprep.subr.bf16.mxu0 %v1876_v0 }
 0x5dd   :  { %1651 = vmatpush3.bf16.msra.mxu0 %v1753_v12 }
 0x680   :  { %v921_v1 = vpop.f32.mrf.mxu0 }
 0x681   :  { %v922_v3 = vadd.f32 %v1352_v63, %v921_v1 }
 0x682   :  { %v1614_v2 = vpop.f32.mrf.mxu0 }
 0x683   :  { %v928_v7 = vmax.f32 %v922_v3, 0.0 }
 0x684   :  { %v924_v4 = vpop.f32.mrf.mxu0 }
 0x685   :  { %v925_v5 = vadd.f32 %v1352_v63, %v924_v4 }
 0x686   :  { %v1615_v6 = vpop.f32.mrf.mxu0 }
 0x687   :  { %v929_v8 = vmax.f32 %v925_v5, 0.0 }
 0x689   :  { %v930_v9 = vpack.c.bf16 %v929_v8, %v928_v7 }
 0x68b   :  { %1633 = vmatmul.mubr.bf16.vlgmr.msra.gmra.mxu1 %v930_v9 }
 0x68c   :  { %1672 = vmatprep.mubr.msk.bf16.mxu1 %vm1877_vm0, %v1876_v0  ;;  %1657 = vmatpush3.bf16.msra.mxu1 %v1754_v13 }
 0x68d   :  { %1658 = vmatprep.subr.bf16.mxu1 %v1876_v0 }
 0x690   :  { %1659 = vmatpush3.bf16.msra.mxu1 %v1755_v14 }
 0x691   :  { %1660 = vmatprep.subr.bf16.mxu1 %v1876_v0 }
 0x694   :  { %1661 = vmatpush3.bf16.msra.mxu1 %v1756_v15 }
 0x695   :  { %1662 = vmatprep.subr.bf16.mxu1 %v1876_v0 }
 0x698   :  { %1663 = vmatpush3.bf16.msra.mxu1 %v1757_v16 }
 0x699   :  { %1664 = vmatprep.subr.bf16.mxu1 %v1876_v0 }
 0x69c   :  { %1665 = vmatpush3.bf16.msra.mxu1 %v1758_v17 }
 0x69d   :  { %1666 = vmatprep.subr.bf16.mxu1 %v1876_v0 }
 0x6a0   :  { %1667 = vmatpush3.bf16.msra.mxu1 %v1759_v28 }
 0x6a1   :  { %1668 = vmatprep.subr.bf16.mxu1 %v1876_v0 }
 0x6a4   :  { %1669 = vmatpush3.bf16.msra.mxu1 %v1760_v29 }
 0x6a5   :  { %1670 = vmatprep.subr.bf16.mxu1 %v1876_v0  ;;  %v1382_v0 = vld [vmem:[%s2112_s9 + $0x3] ss:$0 sm:$0xff] }
 0x6a8   :  { %1671 = vmatpush3.bf16.msra.mxu1 %v1761_v30 }
 0x74b   :  { %v1038_v19 = vpop.f32.mrf.mxu1 }
 0x74c   :  { %v1039_v21 = vadd.f32 %v1362_v18, %v1038_v19 }
 0x74d   :  { %v1634_v20 = vpop.f32.mrf.mxu1 }
 0x74e   :  { %v1045_v25 = vmax.f32 %v1039_v21, 0.0 }
 0x74f   :  { %v1041_v22 = vpop.f32.mrf.mxu1 }
 0x750   :  { %v1042_v23 = vadd.f32 %v1362_v18, %v1041_v22 }
 0x751   :  { %v1635_v24 = vpop.f32.mrf.mxu1 }
 0x752   :  { %v1046_v26 = vmax.f32 %v1042_v23, 0.0 }
 0x754   :  { %v1047_v27 = vpack.c.bf16 %v1046_v26, %v1045_v25 }
 0x756   :  { %1653 = vmatmul.mubr.bf16.vlgmr.msra.gmra.mxu0 %v1047_v27 }
 0x816   :  { %v1155_v32 = vpop.f32.mrf.mxu0 }
 0x817   :  { %v1156_v34 = vadd.f32 %v1372_v31, %v1155_v32 }
 0x818   :  { %v1654_v33 = vpop.f32.mrf.mxu0 }
 0x819   :  { %v1162_v38 = vmax.f32 %v1156_v34, 0.0 }
 0x81a   :  { %v1158_v35 = vpop.f32.mrf.mxu0 }
 0x81b   :  { %v1159_v36 = vadd.f32 %v1372_v31, %v1158_v35 }
 0x81c   :  { %v1655_v37 = vpop.f32.mrf.mxu0 }
 0x81d   :  { %v1163_v39 = vmax.f32 %v1159_v36, 0.0 }
 0x81f   :  { %v1164_v40 = vpack.c.bf16 %v1163_v39, %v1162_v38 }
 0x821   :  { %1673 = vmatmul.mubr.bf16.vlgmr.msra.gmra.mxu1 %v1164_v40 }
 0x8e1   :  { %v1272_v41 = vpop.f32.mrf.mxu1 }
 0x8e2   :  { %v1273_v42 = vadd.f32 %v1382_v0, %v1272_v41 }
 0x8e3   :  { %v1674_v43 = vpop.f32.mrf.mxu1 }
 0x8e4   :  { %1279 = vst [vmem:[#allocation10] sm:$0xff] %v1273_v42 }
 0x8e5   :  { %v1275_v44 = vpop.f32.mrf.mxu1 }
 0x8e6   :  { %v1276_v45 = vadd.f32 %v1382_v0, %v1275_v44 }
 0x8e7   :  { %v1675_v46 = vpop.f32.mrf.mxu1 }
 0x8e8   :  { %1280 = vst [vmem:[#allocation10 + $0x8] sm:$0xff] %v1276_v45 }
 0x8e9   :  { %1853 = shalt.err (!%p1850_p10)
}
 0x8ea   :  { %s1879_s30 = smov 128   ;;  %s1880_s9 = smov 8  }
 0x8eb   :  { %1292 = dma.vmem_to_hbm [thread:$0]  %s1287_s5, 256, %s2113_s10, [#allocation4], %s1879_s30, %s1879_s30, %s1880_s9  }
 0x8ec   :  { %1868 = dma.done.wait [#allocation4], 256  }
 0x8ed   :  { %1869 = vsyncadd [#allocation4], 4294967040 }
 0x8ee   :  { %1296 = vsyncpa [#allocation3], 1 }
 0x8ef   :  { %1297 = vsyncpa [#allocation6], 1 }
 0x8f0   :  { %1298 = vsyncpa [#allocation9], 1 }
 0x8f1   :  { %1299 = vsyncpa [#allocation4], 1 }

</bundles_post_ra>
